<compile_context>
chip_gen: v7x
topology: tpu7x:2x2x1
jax: 0.10.0
libtpu: 0.0.40
codegen_flags: <defaults>
</compile_context>

<pallas_src>
import numpy as np
import jax
import jax.numpy as jnp
from jax import lax
from jax.experimental import pallas as pl
from jax.experimental.pallas import tpu as pltpu

EPS = 1e-5


def _round_up(x, m):
    return ((x + m - 1) // m) * m


def fused_conv_bn_scale_kernel(p_ref, w_ref, o_ref):
    # p_ref : (K_PAD, N*P)  im2col patches, rows ordered (kh, kw, cin); row K is the constant-1
    #                       bias row, remaining rows are zero pad to a sublane multiple.
    # w_ref : (Cout, K_PAD) conv weights with BN(eval)+scaling folded in; column K is the bias.
    # o_ref : (Cout, N*P)   single lane-dense output tile.
    o_ref[...] = jnp.dot(w_ref[...], p_ref[...], preferred_element_type=jnp.float32)


def fused_conv_bn_scale(x_nchw, conv_w, running_mean, running_var, gamma, beta, scaling_factor):
    N, Cin, H, W = x_nchw.shape
    Cout, _, KH, KW = conv_w.shape
    Hout, Wout = H - KH + 1, W - KW + 1
    P, K = Hout * Wout, KH * KW * Cin
    NP = N * P
    K_PAD = _round_up(K + 1, 8)   # 40 here: bias row at index K, sublane-aligned contraction dim

    f32 = jnp.float32

    # ---- glue (plain JAX): build (K_PAD, N*P) patch matrix with one concatenate ----
    # Transposing only the tiny input to (Cin, N, H, W) lets every (kh, kw) window reshape
    # directly into (Cin, N*P) with (n, p)-major columns, so the kernel output reshapes straight
    # to (Cout, N, Hout, Wout) without any large intermediate transpose.
    x_t = jnp.transpose(x_nchw.astype(f32), (1, 0, 2, 3))                 # (Cin, N, H, W)
    rows = [x_t[:, :, kh:kh + Hout, kw:kw + Wout].reshape(Cin, NP)
            for kh in range(KH) for kw in range(KW)]
    rows.append(jnp.ones((1, NP), f32))                                   # bias row (constant 1)
    if K_PAD - K - 1 > 0:
        rows.append(jnp.zeros((K_PAD - K - 1, NP), f32))                  # zero pad
    p_aug = jnp.concatenate(rows, axis=0)                                 # (K_PAD, N*P)

    # ---- fold BN (eval, running stats) + scaling_factor into weights / bias ----
    inv_std = 1.0 / jnp.sqrt(running_var.astype(f32) + EPS)               # (Cout,)
    scale = gamma.astype(f32) * scaling_factor * inv_std                  # (Cout,)
    w_flat = jnp.transpose(conv_w.astype(f32), (2, 3, 1, 0)).reshape(K, Cout)  # rows (kh,kw,cin)
    w_eff = w_flat.T * scale[:, None]                                     # (Cout, K)
    b_eff = beta.astype(f32) * scaling_factor - running_mean.astype(f32) * scale
    w_aug = jnp.concatenate(
        [w_eff, b_eff[:, None], jnp.zeros((Cout, K_PAD - K - 1), f32)], axis=1)  # (Cout, K_PAD)

    # Honest cost hint: real contraction length, actual bytes moved (all f32).
    flops = 2 * Cout * (K + 1) * NP
    bytes_accessed = 4 * (p_aug.size + w_aug.size + Cout * NP)

    out = pl.pallas_call(
        fused_conv_bn_scale_kernel,
        out_shape=jax.ShapeDtypeStruct((Cout, NP), f32),
        grid=(1,),
        in_specs=[
            pl.BlockSpec((K_PAD, NP), lambda i: (0, 0)),
            pl.BlockSpec((Cout, K_PAD), lambda i: (0, 0)),
        ],
        out_specs=pl.BlockSpec((Cout, NP), lambda i: (0, 0)),
        compiler_params=pltpu.CompilerParams(dimension_semantics=("arbitrary",)),
        cost_estimate=pl.CostEstimate(flops=flops, transcendentals=0,
                                      bytes_accessed=bytes_accessed),
    )(p_aug, w_aug)

    # (Cout, N*P) -> NCHW; ~25 KB, negligible.
    return jnp.transpose(out.reshape(Cout, N, Hout, Wout), (1, 0, 2, 3))


def reference(x, w, mean, var, gamma, beta, s):
    y = lax.conv_general_dilated(
        x, w, window_strides=(1, 1), padding="VALID",
        dimension_numbers=("NCHW", "OIHW", "NCHW"))
    inv = 1.0 / jnp.sqrt(var + EPS)
    bcast = lambda v: v[None, :, None, None]
    return (y - bcast(mean)) * bcast(inv) * bcast(gamma * s) + bcast(beta * s)


if __name__ == "__main__":
    # Module config: in_channels=4, out_channels=16, kernel_size=3, scaling_factor=2.0
    N, Cin, H, W = 2, 4, 16, 16
    Cout, KS = 16, 3
    scaling_factor = 2.0

    key = jax.random.PRNGKey(0)
    k_x, k_w, k_g, k_b, k_m, k_v = jax.random.split(key, 6)

    x = jax.random.normal(k_x, (N, Cin, H, W), dtype=jnp.float32)
    conv_w = jax.random.normal(k_w, (Cout, Cin, KS, KS), dtype=jnp.float32) * 0.1
    gamma = 1.0 + 0.1 * jax.random.normal(k_g, (Cout,), dtype=jnp.float32)
    beta = 0.1 * jax.random.normal(k_b, (Cout,), dtype=jnp.float32)
    running_mean = 0.1 * jax.random.normal(k_m, (Cout,), dtype=jnp.float32)
    running_var = jnp.abs(jax.random.normal(k_v, (Cout,), dtype=jnp.float32)) + 0.5

    out = fused_conv_bn_scale(x, conv_w, running_mean, running_var, gamma, beta, scaling_factor)
    out = jax.block_until_ready(out)

    ref = reference(x, conv_w, running_mean, running_var, gamma, beta, scaling_factor)
    assert out.shape == (N, Cout, H - KS + 1, W - KS + 1)
    assert np.allclose(np.asarray(out), np.asarray(ref), rtol=1e-4, atol=1e-4)

    print("KERNEL_OK")
</pallas_src>

<mosaic_0001>
module attributes {stable_mosaic.version = 11 : i64} {
  func.func @fused_conv_bn_scale_kernel(%arg0: i32, %arg1: memref<40x392xf32, #tpu.memory_space<vmem>>, %arg2: memref<16x40xf32, #tpu.memory_space<vmem>>, %arg3: memref<16x392xf32, #tpu.memory_space<vmem>>) attributes {dimension_semantics = [#tpu.dimension_semantics<arbitrary>], iteration_bounds = array<i64: 1>, scalar_prefetch = 0 : i64, scratch_operands = 0 : i64, tpu.core_type = #tpu.core_type<tc>, window_params = [{pipeline_mode = #tpu.pipeline_mode<synchronous>, transform_indices = @transform_0, window_bounds = array<i64: 40, 392>}, {pipeline_mode = #tpu.pipeline_mode<synchronous>, transform_indices = @transform_1, window_bounds = array<i64: 16, 40>}, {pipeline_mode = #tpu.pipeline_mode<synchronous>, transform_indices = @transform_2, window_bounds = array<i64: 16, 392>}]} {
    %c0 = arith.constant 0 : index
    %c0_0 = arith.constant 0 : index
    %0 = vector.load %arg2[%c0, %c0_0] : memref<16x40xf32, #tpu.memory_space<vmem>>, vector<16x40xf32>
    %c0_1 = arith.constant 0 : index
    %c0_2 = arith.constant 0 : index
    %1 = vector.load %arg1[%c0_1, %c0_2] : memref<40x392xf32, #tpu.memory_space<vmem>>, vector<40x392xf32>
    %cst = arith.constant dense<0.000000e+00> : vector<16x392xf32>
    %2 = tpu.matmul %0, %1, %cst {dimension_numbers = #tpu.dot_dimension_numbers<[1], [0], [0], [1], [0, 0, 1, 1], [], []>} : vector<16x40xf32>, vector<40x392xf32>, vector<16x392xf32> -> vector<16x392xf32>
    %c0_3 = arith.constant 0 : index
    %c0_4 = arith.constant 0 : index
    %3 = vector.load %arg3[%c0_3, %c0_4] : memref<16x392xf32, #tpu.memory_space<vmem>>, vector<16x392xf32>
    tpu.vector_store %arg3[%c0_3, %c0_4], %2 {strides = array<i32>} : memref<16x392xf32, #tpu.memory_space<vmem>>, vector<16x392xf32>,
    return
  }
  func.func @transform_0(%arg0: i32) -> (i32, i32) {
    %c0_i32 = arith.constant 0 : i32
    %c0_i32_0 = arith.constant 0 : i32
    %c0_i32_1 = arith.constant 0 : i32
    return %c0_i32, %c0_i32_0 : i32, i32
  }
  func.func @transform_1(%arg0: i32) -> (i32, i32) {
    %c0_i32 = arith.constant 0 : i32
    %c0_i32_0 = arith.constant 0 : i32
    %c0_i32_1 = arith.constant 0 : i32
    return %c0_i32, %c0_i32_0 : i32, i32
  }
  func.func @transform_2(%arg0: i32) -> (i32, i32) {
    %c0_i32 = arith.constant 0 : i32
    %c0_i32_0 = arith.constant 0 : i32
    %c0_i32_1 = arith.constant 0 : i32
    return %c0_i32, %c0_i32_0 : i32, i32
  }
}

</mosaic_0001>

<bundles_post_ra>
// kernel: tpu_custom_call.1
= control target key start
LH: loop header
LB: loop body
LE: loop exit
PB: predicated region body
PF: predicated region fallthrough
CT: control target
= control target key end

     0   :  { %7 = vsyncpa [#allocation3], 0  ;;  %s417_s0 = inlined_call_operand.hbm [shape: f32[40,392], index: 0, kind: input, shape index: {}]   ;;  %s418_s1 = inlined_call_operand.hbm [shape: f32[16,40], index: 1, kind: input, shape index: {}]   ;;  %s419_s2 = inlined_call_operand.hbm [shape: f32[16,392], index: 2, kind: output, shape index: {}]  }
   0x1   :  { %8 = vsyncpa [#allocation6], 0 }
   0x2   :  { %9 = vsyncpa [#allocation4], 0  ;;  %s350_s9 = smov [#allocation2]   ;;  %s278_s13 = scalar_lea.hbm %s417_s0, 2560 }
   0x3   :  { %s15_s10 = sshll.u32 %s350_s9, 4  ;;  %p279_p0 = scmp.ne.s32.totalorder %s417_s0, %s278_s13  ;;  %s16_s10 = int_to_ptr.vmem [resolvable:$true] %s15_s10 }
   0x4   :  { %p282_p1 = scmp.lt.u32.totalorder %s278_s13, %s417_s0 }
   0x6   :  { %p284_p2 = pnand %p282_p1, %p279_p0 }
   0x8   :  { %287 = shalt.err (!%p284_p2)
}
   0x9   :  { %s288_s18 = scalar_lea.vmem %s16_s10, 2560  ;;  %p293_p4 = scmp.lt.s32.totalorder %s16_s10, %s16_s10 }
   0xa   :  { %p289_p3 = scmp.ne.s32.totalorder %s16_s10, %s288_s18  ;;  %p294_p5 = scmp.lt.s32.totalorder %s288_s18, %s288_s18 }
   0xc   :  { %p295_p6 = por %p294_p5, %p293_p4 }
   0xe   :  { %p296_p7 = pnand %p295_p6, %p289_p3 }
  0x10   :  { %299 = shalt.err (!%p296_p7)
}
  0x11   :  { %s351_s19 = smov 512   ;;  %s352_s20 = smov 32  }
  0x12   :  { %21 = dma.hbm_to_vmem [thread:$0]  %s417_s0, 2560, %s16_s10, [#allocation3], %s351_s19, %s351_s19, %s352_s20  }
  0x13   :  { %s353_s23 = smov [#allocation5]   ;;  %s300_s27 = scalar_lea.hbm %s418_s1, 256 }
  0x14   :  { %s27_s24 = sshll.u32 %s353_s23, 4  ;;  %p301_p8 = scmp.ne.s32.totalorder %s418_s1, %s300_s27  ;;  %s28_s24 = int_to_ptr.vmem [resolvable:$true] %s27_s24 }
  0x15   :  { %p304_p9 = scmp.lt.u32.totalorder %s300_s27, %s418_s1 }
  0x17   :  { %p306_p10 = pnand %p304_p9, %p301_p8 }
  0x19   :  { %309 = shalt.err (!%p306_p10)
}
  0x1a   :  { %s310_s4 = scalar_lea.vmem %s28_s24, 256  ;;  %p315_p12 = scmp.lt.s32.totalorder %s28_s24, %s28_s24 }
  0x1b   :  { %p311_p11 = scmp.ne.s32.totalorder %s28_s24, %s310_s4  ;;  %p316_p13 = scmp.lt.s32.totalorder %s310_s4, %s310_s4 }
  0x1d   :  { %p317_p0 = por %p316_p13, %p315_p12 }
  0x1f   :  { %p318_p1 = pnand %p317_p0, %p311_p11 }
  0x21   :  { %321 = shalt.err (!%p318_p1)
}
  0x22   :  { %s354_s0 = smov 128   ;;  %s355_s5 = smov 8  }
  0x23   :  { %33 = dma.hbm_to_vmem [thread:$0]  %s418_s1, 256, %s28_s24, [#allocation6], %s354_s0, %s354_s0, %s355_s5  }
  0x24   :  { %344 = dma.done.wait [#allocation3], 2560  }
  0x25   :  { %345 = vsyncadd [#allocation3], 4294964736 }
  0x26   :  { %346 = dma.done.wait [#allocation6], 256  }
  0x27   :  { %347 = vsyncadd [#allocation6], 4294967040  ;;  %v356_v0 = vmov 0.0   ;;  %v43_v1 = vld [vmem:[#allocation2 + $0x8] sm:$0xff]  ;;  %v45_v3 = vld [vmem:[#allocation2 + $0x18] sm:$0xff]  ;;  %vm62_vm0 = vcmask 326656  }
  0x28   :  { %133 = vmatprep.mubr.f32.mxu0 %v356_v0  ;;  %210 = vmatprep.mubr.f32.mxu1 %v356_v0  ;;  %v47_v2 = vld [vmem:[#allocation2 + $0x28] sm:$0xff]  ;;  %v49_v5 = vld [vmem:[#allocation2 + $0x38] sm:$0xff]  ;;  %v42_v6 = vld [vmem:[#allocation2] sm:$0xff]  ;;  %vm226_vm1 = vcmask 64512   ;;  %s357_s1 = smov [#allocation7]  }
  0x29   :  { %v254_v4 = vpack.c.bf16 %v47_v2, %v43_v1  ;;  %v46_v7 = vld [vmem:[#allocation2 + $0x20] sm:$0xff]  ;;  %v262_v8 = vpack.c.bf16 %v49_v5, %v45_v3  ;;  %v44_v10 = vld [vmem:[#allocation2 + $0x10] sm:$0xff]  ;;  %v51_v12 = vld [vmem:[#allocation2 + $0x48] sm:$0xff]  ;;  %s237_s8 = sshll.u32 %s357_s1, 4  ;;  %s238_s8 = int_to_ptr.vmem [resolvable:$true] %s237_s8 }
  0x2a   :  { %v256_v9 = vpack.c.bf16 %v46_v7, %v42_v6  ;;  %v48_v11 = vld [vmem:[#allocation2 + $0x30] sm:$0xff]  ;;  %v55_v14 = vld [vmem:[#allocation2 + $0x68] sm:$0xff]  ;;  %v53_v15 = vld [vmem:[#allocation2 + $0x58] sm:$0xff]  ;;  %s322_s9 = scalar_lea.vmem %s238_s8, 1024  ;;  %p327_p3 = scmp.lt.s32.totalorder %s238_s8, %s238_s8 }
  0x2b   :  { %255 = vmatprep.subr.bf16.mxu0 %v254_v4  ;;  %v264_v13 = vpack.c.bf16 %v48_v11, %v44_v10  ;;  %v57_v16 = vld [vmem:[#allocation2 + $0x78] sm:$0xff]  ;;  %263 = vmatprep.subr.bf16.mxu1 %v262_v8  ;;  %v258_v17 = vpack.c.bf16 %v55_v14, %v51_v12  ;;  %v50_v19 = vld [vmem:[#allocation2 + $0x40] sm:$0xff]  ;;  %v52_v21 = vld [vmem:[#allocation2 + $0x50] sm:$0xff]  ;;  %p323_p2 = scmp.ne.s32.totalorder %s238_s8, %s322_s9  ;;  %p328_p4 = scmp.lt.s32.totalorder %s322_s9, %s322_s9 }
  0x2c   :  { %257 = vmatpush1.bf16.msra.mxu0 %v256_v9  ;;  %v266_v18 = vpack.c.bf16 %v57_v16, %v53_v15  ;;  %v54_v20 = vld [vmem:[#allocation2 + $0x60] sm:$0xff]  ;;  %v56_v23 = vld [vmem:[#allocation2 + $0x70] sm:$0xff]  ;;  %v59_v25 = vld [vmem:[#allocation2 + $0x88] sm:$0xff] }
  0x2d   :  { %265 = vmatpush1.bf16.msra.mxu1 %v264_v13  ;;  %v260_v22 = vpack.c.bf16 %v54_v20, %v50_v19  ;;  %259 = vmatprep.subr.bf16.mxu0 %v258_v17  ;;  %v268_v24 = vpack.c.bf16 %v56_v23, %v52_v21  ;;  %v61_v26 = vld [vmem:[#allocation2 + $0x98] sm:$0xff]  ;;  %v58_v27 = vld [vmem:[#allocation2 + $0x80] sm:$0xff]  ;;  %v60_v28 = vld [vmem:[#allocation2 + $0x90] sm:$0xff]  ;;  %p329_p5 = por %p328_p4, %p327_p3 }
  0x2e   :  { %267 = vmatprep.subr.bf16.mxu1 %v266_v18  ;;  %v40_v29 = vld [vmem:[#allocation5] sm:$0xff]  ;;  %v41_v30 = vld [vmem:[#allocation5 + $0x8] sm:$0xff] }
  0x2f   :  { %p330_p6 = pnand %p329_p5, %p323_p2 }
  0x30   :  { %261 = vmatpush1.bf16.msra.mxu0 %v260_v22 }
  0x31   :  { %269 = vmatpush1.bf16.msra.mxu1 %v268_v24  ;;  %77 = vmatprep.subr.mxu0 %v59_v25 }
  0x32   :  { %154 = vmatprep.subr.mxu1 %v61_v26 }
  0x34   :  { %78 = vmatpush1.msra.mxu0 %v58_v27 }
  0x35   :  { %155 = vmatpush1.msra.mxu1 %v60_v28  ;;  %250 = vmatmul.mubr.msk.f32.vlgmr.msra.gmra.mrb[0].mxu0 %vm62_vm0, %v40_v29 }
  0x36   :  { %252 = vmatmul.mubr.msk.f32.vlgmr.msra.gmra.mrb[0].mxu1 %vm62_vm0, %v40_v29  ;;  %139 = vmatprep.mubr.f32.mxu0 %v356_v0 }
  0x37   :  { %216 = vmatprep.mubr.f32.mxu1 %v356_v0 }
  0x39   :  { %251 = vmatmul.mubr.msk.f32.gmra.mrb[2].mxu0 %vm62_vm0, %v41_v30 }
  0x3a   :  { %253 = vmatmul.mubr.msk.f32.gmra.mrb[2].mxu1 %vm62_vm0, %v41_v30 }
 0x108   :  { %v135_v31 = vpop.f32.mrb[0].mxu0 }
 0x109   :  { %223 = vst [vmem:[#allocation7] sm:$0xff] %v135_v31  ;;  %v212_v32 = vpop.f32.mrb[0].mxu1  ;;  %v137_v33 = vpop.f32.mrb[1].mxu0 }
 0x10a   :  { %225 = vst [vmem:[#allocation7 + $0x10] sm:$0xff] %v212_v32  ;;  %224 = vst [vmem:[#allocation7 + $0x8] sm:$0xff] %v137_v33  ;;  %v214_v34 = vpop.f32.mrb[1].mxu1 }
 0x10b   :  { %227 = vst.msk [vmem:[#allocation7 + $0x18] sm:$0xff] %vm226_vm1, %v214_v34 }
 0x10c   :  { %v141_v35 = vpop.f32.mrb[2].mxu0 }
 0x10d   :  { %228 = vst [vmem:[#allocation7 + $0x20] sm:$0xff] %v141_v35  ;;  %v218_v36 = vpop.f32.mrb[2].mxu1  ;;  %v143_v37 = vpop.f32.mrb[3].mxu0 }
 0x10e   :  { %230 = vst [vmem:[#allocation7 + $0x30] sm:$0xff] %v218_v36  ;;  %229 = vst [vmem:[#allocation7 + $0x28] sm:$0xff] %v143_v37  ;;  %v220_v38 = vpop.f32.mrb[3].mxu1 }
 0x10f   :  { %231 = vst.msk [vmem:[#allocation7 + $0x38] sm:$0xff] %vm226_vm1, %v220_v38 }
 0x110   :  { %333 = shalt.err (!%p330_p6)
}
 0x111   :  { %s334_s12 = scalar_lea.hbm %s419_s2, 1024 }
 0x112   :  { %p335_p7 = scmp.ne.s32.totalorder %s419_s2, %s334_s12  ;;  %p338_p8 = scmp.lt.u32.totalorder %s334_s12, %s419_s2 }
 0x114   :  { %p340_p9 = pnand %p338_p8, %p335_p7 }
 0x116   :  { %343 = shalt.err (!%p340_p9)
}
 0x117   :  { %243 = dma.vmem_to_hbm [thread:$0]  %s238_s8, 1024, %s419_s2, [#allocation4], %s351_s19, %s351_s19, %s352_s20  }
 0x118   :  { %348 = dma.done.wait [#allocation4], 1024  }
 0x119   :  { %349 = vsyncadd [#allocation4], 4294966272 }
 0x11a   :  { %247 = vsyncpa [#allocation3], 1 }
 0x11b   :  { %248 = vsyncpa [#allocation6], 1 }
 0x11c   :  { %249 = vsyncpa [#allocation4], 1 }

</bundles_post_ra>
